<compile_context>
chip_gen: v7x
topology: tpu7x:2x2x1
jax: 0.10.0
libtpu: 0.0.40
codegen_flags: <defaults>
</compile_context>

<pallas_src>
import jax
import jax.numpy as jnp
from jax.experimental import pallas as pl
from jax.experimental.pallas import tpu as pltpu


def _round_up(v, m):
    return ((v + m - 1) // m) * m


def _cdiv(a, b):
    return (a + b - 1) // b


def mlp_kernel(xin_ref, w1_ref, w2_ref, b2_ref, w3_ref, b3_ref, o_ref):
    """Fused 3-layer MLP on one batch tile: 3 MXU matmuls + 2 EUP tanh + VPU bias adds."""
    xin = xin_ref[...]                                   # [TB, KP]  = [x | t | 1 | 0]
    # Layer 1: t-column and bias are folded into w1 (xin carries t and a 1-column).
    h1 = jnp.tanh(
        jnp.dot(xin.astype(w1_ref.dtype), w1_ref[...],
                preferred_element_type=jnp.float32)
    )
    # Layer 2.
    h2 = jnp.tanh(
        jnp.dot(h1.astype(w2_ref.dtype), w2_ref[...],
                preferred_element_type=jnp.float32)
        + b2_ref[...]
    )
    # Layer 3 (no activation).
    y = jnp.dot(h2.astype(w3_ref.dtype), w3_ref[...],
                preferred_element_type=jnp.float32) + b3_ref[...]
    o_ref[...] = y.astype(o_ref.dtype)                   # lane-dense [TB, 128] store


def init_params(key, input_dim=2, hidden_num=100, dtype=jnp.float32):
    """Matches nn.Linear shapes, stored transposed as [in, out] so y = x @ W + b."""
    ks = jax.random.split(key, 6)

    def linear(kw, kb, fan_in, fan_out):
        bound = 1.0 / jnp.sqrt(jnp.asarray(fan_in, dtype))
        w = jax.random.uniform(kw, (fan_in, fan_out), dtype, -bound, bound)
        b = jax.random.uniform(kb, (1, fan_out), dtype, -bound, bound)
        return w, b

    w1, b1 = linear(ks[0], ks[1], input_dim + 1, hidden_num)
    w2, b2 = linear(ks[2], ks[3], hidden_num, hidden_num)
    w3, b3 = linear(ks[4], ks[5], hidden_num, input_dim)
    return (w1, b1, w2, b2, w3, b3)


def prepare_params(params, input_dim, use_bf16=False):
    """One-time layout prep.

    * Stack [W1 ; b1] into a single first-layer matrix (the wrapper supplies the
      matching [x | t | 1] input), pad its K dim to a multiple of 8.
    * Zero-pad feature dims to 128 (padding is numerically inert: tanh(0)=0 and
      zero rows/cols contribute nothing).
    * Optionally store weight matrices in bf16 for full-rate MXU; biases stay f32.
    """
    w1, b1, w2, b2, w3, b3 = params
    hidden = w2.shape[0]
    out_dim = w3.shape[1]
    HP = _round_up(hidden, 128)       # 100 -> 128
    OP = _round_up(out_dim, 128)      # 2   -> 128
    KP = _round_up(input_dim + 2, 8)  # x (input_dim) + t (1) + bias-one (1) -> 8

    def pad2(a, rows, cols):
        return jnp.pad(a, ((0, rows - a.shape[0]), (0, cols - a.shape[1])))

    # Rows 0..input_dim-1: W1 for x; row input_dim: W1 for t; row input_dim+1: b1.
    w1_full = jnp.concatenate([w1, b1], axis=0)          # [input_dim + 2, hidden]
    w1_full = pad2(w1_full, KP, HP)
    w2p = pad2(w2, HP, HP)
    b2p = pad2(b2, 1, HP)
    w3p = pad2(w3, HP, OP)
    b3p = pad2(b3, 1, OP)

    wdtype = jnp.bfloat16 if use_bf16 else w1.dtype
    w1_full = w1_full.astype(wdtype)
    w2p = w2p.astype(wdtype)
    w3p = w3p.astype(wdtype)
    return (w1_full, w2p, b2p, w3p, b3p), out_dim


def mlp_forward(x_input, t, padded_params, out_dim, tb_max=1024):
    """x_input: [B, input_dim], t: [B, 1] -> [B, out_dim]."""
    w1, w2, b2, w3, b3 = padded_params
    B, input_dim = x_input.shape
    KP = w1.shape[0]
    OP = w3.shape[1]

    # Fold t and the implicit bias-one into the input: [x | t | 1 | zeros] -> [B, KP].
    xin = jnp.concatenate(
        [x_input, t.astype(x_input.dtype), jnp.ones((B, 1), x_input.dtype)], axis=1)
    if KP > input_dim + 2:
        xin = jnp.pad(xin, ((0, 0), (0, KP - (input_dim + 2))))

    # Batch tiling: big tiles to amortize per-step overhead, but keep >= 2 grid
    # steps when possible so the "parallel" axis can shard across v7x's 2 TCs.
    Bp8 = _round_up(max(B, 8), 8)
    TB = max(8, min(tb_max, _round_up(_cdiv(Bp8, 2), 8)))
    Bp = _round_up(Bp8, TB)
    if Bp != B:
        xin = jnp.pad(xin, ((0, Bp - B), (0, 0)))
    grid = (Bp // TB,)

    # Explicit VMEM budget: double-buffered input/output tiles + resident weights
    # (x2 for buffering) + headroom for in-kernel h1/h2 temporaries.  Capped well
    # under v7x's 64 MiB physical VMEM.
    itemsize = xin.dtype.itemsize
    io_bytes = 2 * TB * (KP + OP) * itemsize
    w_bytes = 2 * sum(int(a.size) * a.dtype.itemsize for a in padded_params)
    vmem_limit = int(min(io_bytes + w_bytes + (8 << 20), 48 << 20))

    # Weights/biases use constant index_maps -> fetched once, resident across steps.
    resident = lambda a: pl.BlockSpec(a.shape, lambda i: (0, 0))

    out = pl.pallas_call(
        mlp_kernel,
        out_shape=jax.ShapeDtypeStruct((Bp, OP), x_input.dtype),
        grid_spec=pltpu.PrefetchScalarGridSpec(
            num_scalar_prefetch=0,
            grid=grid,
            in_specs=[
                pl.BlockSpec((TB, KP), lambda i: (i, 0)),
                resident(w1), resident(w2), resident(b2),
                resident(w3), resident(b3),
            ],
            out_specs=pl.BlockSpec((TB, OP), lambda i: (i, 0)),
        ),
        compiler_params=pltpu.CompilerParams(
            dimension_semantics=("parallel",),
            vmem_limit_bytes=vmem_limit,
        ),
    )(xin, w1, w2, b2, w3, b3)

    # Slice back to the logical output (padded rows/cols are numerically inert).
    return out[:B, :out_dim]


if __name__ == "__main__":
    input_dim = 2
    hidden_num = 100     # module default; padded to 128 inside prepare_params
    batch = 8            # small deterministic test batch

    key = jax.random.PRNGKey(0)
    kx, kt, kp = jax.random.split(key, 3)

    x_input = jax.random.normal(kx, (batch, input_dim), jnp.float32)
    t = jax.random.uniform(kt, (batch, 1), jnp.float32)

    params = init_params(kp, input_dim, hidden_num)
    padded_params, out_dim = prepare_params(params, input_dim, use_bf16=False)

    out = mlp_forward(x_input, t, padded_params, out_dim)
    out = jax.block_until_ready(out)

    # Reference check in plain JAX (same math, unpadded params).
    w1, b1, w2, b2, w3, b3 = params
    inp = jnp.concatenate([x_input, t], axis=1)
    ref = jnp.tanh(inp @ w1 + b1)
    ref = jnp.tanh(ref @ w2 + b2)
    ref = ref @ w3 + b3

    assert out.shape == (batch, out_dim)
    err = float(jnp.max(jnp.abs(out - ref)))
    assert jnp.allclose(out, ref, atol=1e-4, rtol=1e-4), err

    print("KERNEL_OK")
</pallas_src>

<mosaic_0001>
module attributes {stable_mosaic.version = 11 : i64} {
  func.func @mlp_kernel(%arg0: i32, %arg1: memref<8x8xf32, #tpu.memory_space<vmem>>, %arg2: memref<8x128xf32, #tpu.memory_space<vmem>>, %arg3: memref<128x128xf32, #tpu.memory_space<vmem>>, %arg4: memref<1x128xf32, #tpu.memory_space<vmem>>, %arg5: memref<128x128xf32, #tpu.memory_space<vmem>>, %arg6: memref<1x128xf32, #tpu.memory_space<vmem>>, %arg7: memref<8x128xf32, #tpu.memory_space<vmem>>) attributes {dimension_semantics = [#tpu.dimension_semantics<parallel>], iteration_bounds = array<i64: 1>, scalar_prefetch = 0 : i64, scratch_operands = 0 : i64, tpu.core_type = #tpu.core_type<tc>, window_params = [{transform_indices = @transform_0, window_bounds = array<i64: 8, 8>}, {pipeline_mode = #tpu.pipeline_mode<synchronous>, transform_indices = @transform_1, window_bounds = array<i64: 8, 128>}, {pipeline_mode = #tpu.pipeline_mode<synchronous>, transform_indices = @transform_2, window_bounds = array<i64: 128, 128>}, {pipeline_mode = #tpu.pipeline_mode<synchronous>, transform_indices = @transform_3, window_bounds = array<i64: 1, 128>}, {pipeline_mode = #tpu.pipeline_mode<synchronous>, transform_indices = @transform_4, window_bounds = array<i64: 128, 128>}, {pipeline_mode = #tpu.pipeline_mode<synchronous>, transform_indices = @transform_5, window_bounds = array<i64: 1, 128>}, {transform_indices = @transform_6, window_bounds = array<i64: 8, 128>}]} {
    %c0 = arith.constant 0 : index
    %c0_0 = arith.constant 0 : index
    %0 = vector.load %arg1[%c0, %c0_0] : memref<8x8xf32, #tpu.memory_space<vmem>>, vector<8x8xf32>
    %c0_1 = arith.constant 0 : index
    %c0_2 = arith.constant 0 : index
    %1 = vector.load %arg2[%c0_1, %c0_2] : memref<8x128xf32, #tpu.memory_space<vmem>>, vector<8x128xf32>
    %cst = arith.constant dense<0.000000e+00> : vector<8x128xf32>
    %2 = tpu.matmul %0, %1, %cst {dimension_numbers = #tpu.dot_dimension_numbers<[1], [0], [0], [1], [0, 0, 1, 1], [], []>} : vector<8x8xf32>, vector<8x128xf32>, vector<8x128xf32> -> vector<8x128xf32>
    %3 = math.tanh %2 : vector<8x128xf32>
    %c0_3 = arith.constant 0 : index
    %c0_4 = arith.constant 0 : index
    %4 = vector.load %arg3[%c0_3, %c0_4] : memref<128x128xf32, #tpu.memory_space<vmem>>, vector<128x128xf32>
    %cst_5 = arith.constant dense<0.000000e+00> : vector<8x128xf32>
    %5 = tpu.matmul %3, %4, %cst_5 {dimension_numbers = #tpu.dot_dimension_numbers<[1], [0], [0], [1], [0, 0, 1, 1], [], []>} : vector<8x128xf32>, vector<128x128xf32>, vector<8x128xf32> -> vector<8x128xf32>
    %c0_6 = arith.constant 0 : index
    %c0_7 = arith.constant 0 : index
    %6 = vector.load %arg4[%c0_6, %c0_7] : memref<1x128xf32, #tpu.memory_space<vmem>>, vector<1x128xf32>
    %7 = vector.broadcast %6 : vector<1x128xf32> to vector<8x128xf32>
    %8 = arith.addf %5, %7 : vector<8x128xf32>
    %9 = math.tanh %8 : vector<8x128xf32>
    %c0_8 = arith.constant 0 : index
    %c0_9 = arith.constant 0 : index
    %10 = vector.load %arg5[%c0_8, %c0_9] : memref<128x128xf32, #tpu.memory_space<vmem>>, vector<128x128xf32>
    %cst_10 = arith.constant dense<0.000000e+00> : vector<8x128xf32>
    %11 = tpu.matmul %9, %10, %cst_10 {dimension_numbers = #tpu.dot_dimension_numbers<[1], [0], [0], [1], [0, 0, 1, 1], [], []>} : vector<8x128xf32>, vector<128x128xf32>, vector<8x128xf32> -> vector<8x128xf32>
    %c0_11 = arith.constant 0 : index
    %c0_12 = arith.constant 0 : index
    %12 = vector.load %arg6[%c0_11, %c0_12] : memref<1x128xf32, #tpu.memory_space<vmem>>, vector<1x128xf32>
    %13 = vector.broadcast %12 : vector<1x128xf32> to vector<8x128xf32>
    %14 = arith.addf %11, %13 : vector<8x128xf32>
    %c0_13 = arith.constant 0 : index
    %c0_14 = arith.constant 0 : index
    %15 = vector.load %arg7[%c0_13, %c0_14] : memref<8x128xf32, #tpu.memory_space<vmem>>, vector<8x128xf32>
    tpu.vector_store %arg7[%c0_13, %c0_14], %14 {strides = array<i32>} : memref<8x128xf32, #tpu.memory_space<vmem>>, vector<8x128xf32>,
    return
  }
  func.func @transform_0(%arg0: i32) -> (i32, i32) {
    %c0_i32 = arith.constant 0 : i32
    %c0_i32_0 = arith.constant 0 : i32
    return %arg0, %c0_i32 : i32, i32
  }
  func.func @transform_1(%arg0: i32) -> (i32, i32) {
    %c0_i32 = arith.constant 0 : i32
    %c0_i32_0 = arith.constant 0 : i32
    %c0_i32_1 = arith.constant 0 : i32
    return %c0_i32, %c0_i32_0 : i32, i32
  }
  func.func @transform_2(%arg0: i32) -> (i32, i32) {
    %c0_i32 = arith.constant 0 : i32
    %c0_i32_0 = arith.constant 0 : i32
    %c0_i32_1 = arith.constant 0 : i32
    return %c0_i32, %c0_i32_0 : i32, i32
  }
  func.func @transform_3(%arg0: i32) -> (i32, i32) {
    %c0_i32 = arith.constant 0 : i32
    %c0_i32_0 = arith.constant 0 : i32
    %c0_i32_1 = arith.constant 0 : i32
    return %c0_i32, %c0_i32_0 : i32, i32
  }
  func.func @transform_4(%arg0: i32) -> (i32, i32) {
    %c0_i32 = arith.constant 0 : i32
    %c0_i32_0 = arith.constant 0 : i32
    %c0_i32_1 = arith.constant 0 : i32
    return %c0_i32, %c0_i32_0 : i32, i32
  }
  func.func @transform_5(%arg0: i32) -> (i32, i32) {
    %c0_i32 = arith.constant 0 : i32
    %c0_i32_0 = arith.constant 0 : i32
    %c0_i32_1 = arith.constant 0 : i32
    return %c0_i32, %c0_i32_0 : i32, i32
  }
  func.func @transform_6(%arg0: i32) -> (i32, i32) {
    %c0_i32 = arith.constant 0 : i32
    %c0_i32_0 = arith.constant 0 : i32
    return %arg0, %c0_i32 : i32, i32
  }
}

</mosaic_0001>

<bundles_post_ra>
// kernel: tpu_custom_call.1
= control target key start
LH: loop header
LB: loop body
LE: loop exit
PB: predicated region body
PF: predicated region fallthrough
CT: control target
= control target key end

     0   :  { %11 = vsyncpa [#allocation3], 0  ;;  %s781_s0 = inlined_call_operand.hbm [shape: f32[8,8], index: 0, kind: input, shape index: {}]   ;;  %s782_s1 = inlined_call_operand.hbm [shape: f32[8,128], index: 1, kind: input, shape index: {}]   ;;  %s783_s2 = inlined_call_operand.hbm [shape: f32[128,128], index: 2, kind: input, shape index: {}]   ;;  %s784_s3 = inlined_call_operand.vmem [shape: f32[1,128], index: 3, kind: input, shape index: {}]   ;;  %s785_s4 = inlined_call_operand.hbm [shape: f32[128,128], index: 4, kind: input, shape index: {}]   ;;  %s786_s5 = inlined_call_operand.vmem [shape: f32[1,128], index: 5, kind: input, shape index: {}]   ;;  %s787_s6 = inlined_call_operand.hbm [shape: f32[8,128], index: 6, kind: output, shape index: {}]  }
   0x1   :  { %12 = vsyncpa [#allocation6], 0 }
   0x2   :  { %13 = vsyncpa [#allocation9], 0 }
   0x3   :  { %14 = vsyncpa [#allocation4], 0  ;;  %s651_s21 = smov [#allocation5]   ;;  %s652_s23 = smov [#allocation2]  }
   0x4   :  { %s31_s22 = sshll.u32 %s651_s21, 4  ;;  %s21_s24 = sshll.u32 %s652_s23, 4  ;;  %s32_s22 = int_to_ptr.vmem [resolvable:$true] %s31_s22  ;;  %s22_s24 = int_to_ptr.vmem [resolvable:$true] %s21_s24 }
   0x5   :  { %s533_s27 = scalar_lea.hbm %s782_s1, 128 }
   0x6   :  { %p534_p0 = scmp.ne.s32.totalorder %s782_s1, %s533_s27  ;;  %p537_p1 = scmp.lt.u32.totalorder %s533_s27, %s782_s1 }
   0x8   :  { %p539_p2 = pnand %p537_p1, %p534_p0 }
   0xa   :  { %542 = shalt.err (!%p539_p2)
}
   0xb   :  { %s543_s8 = scalar_lea.vmem %s32_s22, 128  ;;  %p548_p4 = scmp.lt.s32.totalorder %s32_s22, %s32_s22 }
   0xc   :  { %p544_p3 = scmp.ne.s32.totalorder %s32_s22, %s543_s8  ;;  %p549_p5 = scmp.lt.s32.totalorder %s543_s8, %s543_s8 }
   0xe   :  { %p550_p6 = por %p549_p5, %p548_p4 }
  0x10   :  { %p551_p7 = pnand %p550_p6, %p544_p3 }
  0x12   :  { %554 = shalt.err (!%p551_p7)
}
  0x13   :  { %34 = dma.hbm_to_vmem [thread:$0]  %s782_s1, 128, %s32_s22, [#allocation6]  }
  0x14   :  { %s555_s13 = scalar_lea.hbm %s781_s0, 128 }
  0x15   :  { %p556_p8 = scmp.ne.s32.totalorder %s781_s0, %s555_s13  ;;  %p559_p9 = scmp.lt.u32.totalorder %s555_s13, %s781_s0 }
  0x17   :  { %p561_p10 = pnand %p559_p9, %p556_p8 }
  0x19   :  { %564 = shalt.err (!%p561_p10)
}
  0x1a   :  { %s565_s18 = scalar_lea.vmem %s22_s24, 128  ;;  %p570_p12 = scmp.lt.s32.totalorder %s22_s24, %s22_s24 }
  0x1b   :  { %p566_p11 = scmp.ne.s32.totalorder %s22_s24, %s565_s18  ;;  %p571_p13 = scmp.lt.s32.totalorder %s565_s18, %s565_s18 }
  0x1d   :  { %p572_p0 = por %p571_p13, %p570_p12 }
  0x1f   :  { %p573_p1 = pnand %p572_p0, %p566_p11 }
  0x21   :  { %576 = shalt.err (!%p573_p1)
}
  0x22   :  { %24 = dma.hbm_to_vmem [thread:$0]  %s781_s0, 128, %s22_s24, [#allocation3]  }
  0x23   :  { %s653_s20 = smov [#allocation7]   ;;  %s577_s25 = scalar_lea.hbm %s783_s2, 2048 }
  0x24   :  { %s40_s21 = sshll.u32 %s653_s20, 4  ;;  %p578_p2 = scmp.ne.s32.totalorder %s783_s2, %s577_s25  ;;  %s41_s21 = int_to_ptr.vmem [resolvable:$true] %s40_s21 }
  0x25   :  { %p581_p3 = scmp.lt.u32.totalorder %s577_s25, %s783_s2 }
  0x27   :  { %p583_p4 = pnand %p581_p3, %p578_p2 }
  0x29   :  { %586 = shalt.err (!%p583_p4)
}
  0x2a   :  { %s587_s30 = scalar_lea.vmem %s41_s21, 2048  ;;  %p592_p6 = scmp.lt.s32.totalorder %s41_s21, %s41_s21 }
  0x2b   :  { %p588_p5 = scmp.ne.s32.totalorder %s41_s21, %s587_s30  ;;  %p593_p7 = scmp.lt.s32.totalorder %s587_s30, %s587_s30 }
  0x2d   :  { %p594_p8 = por %p593_p7, %p592_p6 }
  0x2f   :  { %p595_p9 = pnand %p594_p8, %p588_p5 }
  0x31   :  { %598 = shalt.err (!%p595_p9)
}
  0x32   :  { %s654_s0 = smov 128   ;;  %s655_s24 = smov 8  }
  0x33   :  { %46 = dma.hbm_to_vmem [thread:$0]  %s783_s2, 2048, %s41_s21, [#allocation6], %s654_s0, %s654_s0, %s655_s24  }
  0x34   :  { %s656_s9 = smov [#allocation8]   ;;  %s599_s13 = scalar_lea.hbm %s785_s4, 2048 }
  0x35   :  { %s54_s10 = sshll.u32 %s656_s9, 4  ;;  %p600_p10 = scmp.ne.s32.totalorder %s785_s4, %s599_s13  ;;  %s55_s10 = int_to_ptr.vmem [resolvable:$true] %s54_s10 }
  0x36   :  { %p603_p11 = scmp.lt.u32.totalorder %s599_s13, %s785_s4 }
  0x38   :  { %p605_p12 = pnand %p603_p11, %p600_p10 }
  0x3a   :  { %608 = shalt.err (!%p605_p12)
}
  0x3b   :  { %s609_s18 = scalar_lea.vmem %s55_s10, 2048  ;;  %p614_p0 = scmp.lt.s32.totalorder %s55_s10, %s55_s10 }
  0x3c   :  { %p610_p13 = scmp.ne.s32.totalorder %s55_s10, %s609_s18  ;;  %p615_p1 = scmp.lt.s32.totalorder %s609_s18, %s609_s18 }
  0x3e   :  { %p616_p2 = por %p615_p1, %p614_p0 }
  0x40   :  { %p617_p3 = pnand %p616_p2, %p610_p13 }
  0x42   :  { %620 = shalt.err (!%p617_p3)
}
  0x43   :  { %60 = dma.hbm_to_vmem [thread:$0]  %s785_s4, 2048, %s55_s10, [#allocation9], %s654_s0, %s654_s0, %s655_s24  }
  0x44   :  { %643 = dma.done.wait [#allocation3], 128  }
  0x45   :  { %644 = vsyncadd [#allocation3], 4294967168 }
  0x46   :  { %645 = dma.done.wait [#allocation6], 2176  }
  0x47   :  { %646 = vsyncadd [#allocation6], 4294965120 }
  0x48   :  { %647 = dma.done.wait [#allocation9], 2048  }
  0x49   :  { %648 = vsyncadd [#allocation9], 4294965248  ;;  %v657_v0 = vmov 0.0   ;;  %vm658_vm0 = vmmov 0   ;;  %v659_v1 = vmov 0.0|0.0   ;;  %vm77_vm1 = vcmask 64512  }
  0x4a   :  { %396 = vmatprep.subr.mxu0 %v657_v0  ;;  %398 = vmatprep.mubr.msk.f32.mxu0 %vm658_vm0, %v657_v0  ;;  %v76_v2 = vld [vmem:[#allocation5] sm:$0xff]  ;;  %v75_v3 = vld [vmem:[#allocation2] sm:$0xff]  ;;  %v152_v4 = vld [vmem:[#allocation7] sm:$0xff]  ;;  %s660_s22 = smov [#allocation10]  }
  0x4b   :  { %471 = vmatprep.subr.bf16.mxu1 %v659_v1  ;;  %433 = vmatprep.mubr.msk.f32.mxu1 %vm658_vm0, %v657_v0  ;;  %v153_v5 = vld [vmem:[#allocation7 + $0x8] sm:$0xff]  ;;  %v154_v6 = vld [vmem:[#allocation7 + $0x10] sm:$0xff]  ;;  %v155_v7 = vld [vmem:[#allocation7 + $0x18] sm:$0xff]  ;;  %s346_s23 = sshll.u32 %s660_s22, 4  ;;  %s347_s23 = int_to_ptr.vmem [resolvable:$true] %s346_s23 }
  0x4c   :  { %397 = vmatpush3.msra.mxu0 %v76_v2  ;;  %v472_v8 = vpack.c.bf16 %v153_v5, %v152_v4  ;;  %v475_v9 = vpack.c.bf16 %v155_v7, %v154_v6  ;;  %v156_v10 = vld [vmem:[#allocation7 + $0x20] sm:$0xff]  ;;  %v157_v11 = vld [vmem:[#allocation7 + $0x28] sm:$0xff]  ;;  %v158_v13 = vld [vmem:[#allocation7 + $0x30] sm:$0xff]  ;;  %s621_s25 = scalar_lea.vmem %s347_s23, 128  ;;  %p626_p5 = scmp.lt.s32.totalorder %s347_s23, %s347_s23 }
  0x4d   :  { %399 = vmatmul.mubr.msk.f32.vlgmr.msra.gmra.mrb[0].mxu0 %vm77_vm1, %v75_v3  ;;  %495 = vmatprep.subr.bf16.mxu0 %v659_v1  ;;  %v478_v12 = vpack.c.bf16 %v157_v11, %v156_v10  ;;  %v159_v14 = vld [vmem:[#allocation7 + $0x38] sm:$0xff]  ;;  %v160_v16 = vld [vmem:[#allocation7 + $0x40] sm:$0xff]  ;;  %v161_v17 = vld [vmem:[#allocation7 + $0x48] sm:$0xff]  ;;  %p622_p4 = scmp.ne.s32.totalorder %s347_s23, %s621_s25  ;;  %p627_p6 = scmp.lt.s32.totalorder %s621_s25, %s621_s25 }
  0x4e   :  { %468 = vmatprep.mubr.msk.f32.mxu0 %vm658_vm0, %v657_v0  ;;  %473 = vmatpush3.bf16.msra.mxu1 %v472_v8  ;;  %v481_v15 = vpack.c.bf16 %v159_v14, %v158_v13  ;;  %v484_v18 = vpack.c.bf16 %v161_v17, %v160_v16  ;;  %v162_v19 = vld [vmem:[#allocation7 + $0x50] sm:$0xff]  ;;  %v163_v20 = vld [vmem:[#allocation7 + $0x58] sm:$0xff]  ;;  %v164_v22 = vld [vmem:[#allocation7 + $0x60] sm:$0xff] }
  0x4f   :  { %474 = vmatprep.subr.bf16.mxu1 %v659_v1  ;;  %v487_v21 = vpack.c.bf16 %v163_v20, %v162_v19  ;;  %v165_v23 = vld [vmem:[#allocation7 + $0x68] sm:$0xff]  ;;  %v166_v25 = vld [vmem:[#allocation7 + $0x70] sm:$0xff]  ;;  %v167_v26 = vld [vmem:[#allocation7 + $0x78] sm:$0xff]  ;;  %p628_p7 = por %p627_p6, %p626_p5 }
  0x50   :  { %v490_v24 = vpack.c.bf16 %v165_v23, %v164_v22  ;;  %v493_v27 = vpack.c.bf16 %v167_v26, %v166_v25  ;;  %v246_v28 = vld [vmem:[#allocation8] sm:$0xff]  ;;  %v247_v29 = vld [vmem:[#allocation8 + $0x8] sm:$0xff]  ;;  %v248_v30 = vld [vmem:[#allocation8 + $0x10] sm:$0xff] }
  0x51   :  { %v496_v31 = vpack.c.bf16 %v247_v29, %v246_v28  ;;  %v249_v32 = vld [vmem:[#allocation8 + $0x18] sm:$0xff]  ;;  %v250_v34 = vld [vmem:[#allocation8 + $0x20] sm:$0xff]  ;;  %v251_v35 = vld [vmem:[#allocation8 + $0x28] sm:$0xff]  ;;  %p629_p8 = pnand %p628_p7, %p622_p4 }
  0x52   :  { %476 = vmatpush3.bf16.msra.mxu1 %v475_v9  ;;  %v499_v33 = vpack.c.bf16 %v249_v32, %v248_v30  ;;  %v502_v36 = vpack.c.bf16 %v251_v35, %v250_v34  ;;  %v252_v37 = vld [vmem:[#allocation8 + $0x30] sm:$0xff]  ;;  %v253_v38 = vld [vmem:[#allocation8 + $0x38] sm:$0xff]  ;;  %v254_v40 = vld [vmem:[#allocation8 + $0x40] sm:$0xff] }
  0x53   :  { %477 = vmatprep.subr.bf16.mxu1 %v659_v1  ;;  %497 = vmatpush3.bf16.msra.mxu0 %v496_v31  ;;  %v505_v39 = vpack.c.bf16 %v253_v38, %v252_v37  ;;  %v255_v41 = vld [vmem:[#allocation8 + $0x48] sm:$0xff]  ;;  %v256_v46 = vld [vmem:[#allocation8 + $0x50] sm:$0xff]  ;;  %v257_v47 = vld [vmem:[#allocation8 + $0x58] sm:$0xff] }
  0x54   :  { %498 = vmatprep.subr.bf16.mxu0 %v659_v1  ;;  %v508_v42 = vpack.c.bf16 %v255_v41, %v254_v40  ;;  %v511_v48 = vpack.c.bf16 %v257_v47, %v256_v46  ;;  %v258_v49 = vld [vmem:[#allocation8 + $0x60] sm:$0xff]  ;;  %v259_v50 = vld [vmem:[#allocation8 + $0x68] sm:$0xff]  ;;  %v260_v52 = vld [vmem:[#allocation8 + $0x70] sm:$0xff] }
  0x55   :  { %v514_v51 = vpack.c.bf16 %v259_v50, %v258_v49  ;;  %v261_v53 = vld [vmem:[#allocation8 + $0x78] sm:$0xff]  ;;  %v358_v55 = vld [vmem:[%s784_s3] ss:$0 sm:$0xff] }
  0x56   :  { %479 = vmatpush3.bf16.msra.mxu1 %v478_v12  ;;  %v517_v54 = vpack.c.bf16 %v261_v53, %v260_v52  ;;  %v359_v60 = vld [vmem:[%s786_s5] ss:$0 sm:$0xff] }
  0x57   :  { %480 = vmatprep.subr.bf16.mxu1 %v659_v1  ;;  %500 = vmatpush3.bf16.msra.mxu0 %v499_v33 }
  0x58   :  { %501 = vmatprep.subr.bf16.mxu0 %v659_v1 }
  0x5a   :  { %482 = vmatpush3.bf16.msra.mxu1 %v481_v15 }
  0x5b   :  { %483 = vmatprep.subr.bf16.mxu1 %v659_v1  ;;  %503 = vmatpush3.bf16.msra.mxu0 %v502_v36 }
  0x5c   :  { %504 = vmatprep.subr.bf16.mxu0 %v659_v1 }
  0x5e   :  { %485 = vmatpush3.bf16.msra.mxu1 %v484_v18 }
  0x5f   :  { %486 = vmatprep.subr.bf16.mxu1 %v659_v1  ;;  %506 = vmatpush3.bf16.msra.mxu0 %v505_v39 }
  0x60   :  { %507 = vmatprep.subr.bf16.mxu0 %v659_v1 }
  0x62   :  { %488 = vmatpush3.bf16.msra.mxu1 %v487_v21 }
  0x63   :  { %489 = vmatprep.subr.bf16.mxu1 %v659_v1  ;;  %509 = vmatpush3.bf16.msra.mxu0 %v508_v42 }
  0x64   :  { %510 = vmatprep.subr.bf16.mxu0 %v659_v1 }
  0x66   :  { %491 = vmatpush3.bf16.msra.mxu1 %v490_v24 }
  0x67   :  { %492 = vmatprep.subr.bf16.mxu1 %v659_v1  ;;  %512 = vmatpush3.bf16.msra.mxu0 %v511_v48 }
  0x68   :  { %513 = vmatprep.subr.bf16.mxu0 %v659_v1 }
  0x6a   :  { %494 = vmatpush3.bf16.msra.mxu1 %v493_v27 }
  0x6b   :  { %515 = vmatpush3.bf16.msra.mxu0 %v514_v51 }
  0x6c   :  { %516 = vmatprep.subr.bf16.mxu0 %v659_v1 }
  0x6f   :  { %518 = vmatpush3.bf16.msra.mxu0 %v517_v54 }
 0x120   :  { %v147_v43 = vpop.f32.mrb[0].mxu0 }
 0x121   :  { %529 = vtanh.f32 %v147_v43  ;;  %v400_v44 = vpop.f32.mrb[1].mxu0 }
 0x12b   :  { %v530_v45 = vpop.eup %529 }
 0x12c   :  { %434 = vmatmul.mubr.f32.vlgmr.msra.gmra.mrb[0].mxu1 %v530_v45 }
 0x1ff   :  { %v241_v56 = vpop.f32.mrb[0].mxu1 }
 0x200   :  { %v242_v57 = vadd.f32 %v358_v55, %v241_v56  ;;  %v435_v58 = vpop.f32.mrb[1].mxu1 }
 0x202   :  { %531 = vtanh.f32 %v242_v57 }
 0x20c   :  { %v532_v59 = vpop.eup %531 }
 0x20d   :  { %469 = vmatmul.mubr.f32.vlgmr.msra.gmra.mrb[2].mxu0 %v532_v59 }
 0x2e0   :  { %v335_v61 = vpop.f32.mrb[2].mxu0 }
 0x2e1   :  { %v336_v62 = vadd.f32 %v359_v60, %v335_v61  ;;  %v470_v63 = vpop.f32.mrb[3].mxu0 }
 0x2e3   :  { %339 = vst [vmem:[#allocation10] sm:$0xff] %v336_v62 }
 0x2e4   :  { %632 = shalt.err (!%p629_p8)
}
 0x2e5   :  { %s633_s27 = scalar_lea.hbm %s787_s6, 128 }
 0x2e6   :  { %p634_p9 = scmp.ne.s32.totalorder %s787_s6, %s633_s27  ;;  %p637_p10 = scmp.lt.u32.totalorder %s633_s27, %s787_s6 }
 0x2e8   :  { %p639_p11 = pnand %p637_p10, %p634_p9 }
 0x2ea   :  { %642 = shalt.err (!%p639_p11)
}
 0x2eb   :  { %349 = dma.vmem_to_hbm [thread:$0]  %s347_s23, 128, %s787_s6, [#allocation4]  }
 0x2ec   :  { %649 = dma.done.wait [#allocation4], 128  }
 0x2ed   :  { %650 = vsyncadd [#allocation4], 4294967168 }
 0x2ee   :  { %353 = vsyncpa [#allocation3], 1 }
 0x2ef   :  { %354 = vsyncpa [#allocation6], 1 }
 0x2f0   :  { %355 = vsyncpa [#allocation9], 1 }
 0x2f1   :  { %356 = vsyncpa [#allocation4], 1 }

</bundles_post_ra>
